<compile_context>
chip_gen: v5e
topology: v5e:2x2
jax: 0.10.0
libtpu: 0.0.40
codegen_flags: <defaults>
</compile_context>

<pallas_src>
import math
import jax
import jax.numpy as jnp
from jax.experimental import pallas as pl
from jax.experimental.pallas import tpu as pltpu


def _round_up(n: int, m: int) -> int:
    return ((n + m - 1) // m) * m


def _hadamard_kernel(x_ref, w_ref, b_ref, o_ref):
    # x_ref: (TP, K)    packed input row-tile  (K = k*D lanes, lane-dense)
    # w_ref: (K, 2K)    fused (block-diagonal when packed) weights, bf16, resident
    # b_ref: (1, 2K)    fused packed bias, f32, resident
    # o_ref: (TP, K)    packed output tile
    x = x_ref[...].astype(w_ref.dtype)                    # bf16 for the MXU
    y = jnp.dot(x, w_ref[...], preferred_element_type=jnp.float32) + b_ref[...]
    half = y.shape[-1] // 2                               # = K -> vreg-aligned split
    o_ref[...] = (y[:, :half] * y[:, half:]).astype(o_ref.dtype)


def hadamard_feature_map(x, w1, b1, w2, b2, *, tile_m=512, compute_dtype=jnp.bfloat16):
    """out = (x @ w1.T + b1) * (x @ w2.T + b2).

    x: (..., D); w1, w2: (D, D) in PyTorch (out, in) convention; b1, b2: (D,).
    """
    orig_shape = x.shape
    D = orig_shape[-1]
    x2d = x.reshape(-1, D)
    M = x2d.shape[0]

    # Lane-packing factor: pack k rows into one 128-lane row when D < 128.
    k = 128 // D if (D < 128 and 128 % D == 0) else 1
    K = k * D

    # Rows (original units) per grid step: multiple of 8*k, clipped for tiny inputs.
    row_quantum = 8 * k
    tile_rows = _round_up(min(tile_m, _round_up(M, row_quantum)), row_quantum)
    M_pad = _round_up(M, tile_rows)
    tile_p = tile_rows // k                     # packed rows per step (multiple of 8)
    grid = (M_pad // tile_rows,)

    if M_pad != M:
        x2d = jnp.pad(x2d, ((0, M_pad - M), (0, 0)))
    xp = x2d.reshape(M_pad // k, K)             # free row-major lane-packing

    # Fused (+ block-diagonal) weights: first K output lanes give layer1(x) for
    # every packed row-group, next K lanes give layer2(x).
    w1t = w1.T.astype(compute_dtype)            # (D, D) in (in, out) layout
    w2t = w2.T.astype(compute_dtype)
    if k > 1:
        eye = jnp.eye(k, dtype=compute_dtype)
        w1p = jnp.kron(eye, w1t)                # (K, K) block diagonal
        w2p = jnp.kron(eye, w2t)
    else:
        w1p, w2p = w1t, w2t
    wp = jnp.concatenate([w1p, w2p], axis=1)    # (K, 2K)
    bp = jnp.concatenate([jnp.tile(b1, k), jnp.tile(b2, k)]).astype(jnp.float32)
    bp = bp.reshape(1, 2 * K)

    itemsize = x2d.dtype.itemsize
    # 2x-buffered x/out tiles + 2x-buffered (small, resident) weights & bias.
    vmem_need = (4 * tile_p * K * itemsize
                 + 2 * K * (2 * K) * jnp.dtype(compute_dtype).itemsize
                 + 2 * (2 * K) * 4)
    vmem_limit = int(min(max(2 * vmem_need, 32 * 1024 * 1024), 100 * 1024 * 1024))

    cost = pl.CostEstimate(
        flops=2 * (M_pad // k) * K * (2 * K) + 3 * M_pad * D,
        transcendentals=0,
        bytes_accessed=2 * M_pad * D * itemsize
        + wp.size * wp.dtype.itemsize
        + bp.size * bp.dtype.itemsize,
    )

    out_packed = pl.pallas_call(
        _hadamard_kernel,
        out_shape=jax.ShapeDtypeStruct((M_pad // k, K), x.dtype),
        grid=grid,
        in_specs=[
            pl.BlockSpec((tile_p, K), lambda i: (i, 0)),     # packed x tile
            pl.BlockSpec((K, 2 * K), lambda i: (0, 0)),      # fused weights (resident)
            pl.BlockSpec((1, 2 * K), lambda i: (0, 0)),      # fused bias (resident)
        ],
        out_specs=pl.BlockSpec((tile_p, K), lambda i: (i, 0)),
        compiler_params=pltpu.CompilerParams(
            dimension_semantics=("parallel",),
            vmem_limit_bytes=vmem_limit,
        ),
        cost_estimate=cost,
    )(xp, wp, bp)

    out2d = out_packed.reshape(M_pad, D)[:M]    # free un-packing + strip padding
    return out2d.reshape(orig_shape)


def _init_linear_params(key, head_dim):
    """Deterministic init matching nn.Linear's kaiming-uniform style bounds."""
    kw, kb = jax.random.split(key)
    bound = 1.0 / math.sqrt(head_dim)
    w = jax.random.uniform(kw, (head_dim, head_dim), jnp.float32, -bound, bound)
    b = jax.random.uniform(kb, (head_dim,), jnp.float32, -bound, bound)
    return w, b


if __name__ == "__main__":
    key = jax.random.PRNGKey(0)
    k_x, k_l1, k_l2 = jax.random.split(key, 3)

    batch, seq, head_dim = 2, 8, 32
    x = jax.random.normal(k_x, (batch, seq, head_dim), jnp.float32)

    w1, b1 = _init_linear_params(k_l1, head_dim)
    w2, b2 = _init_linear_params(k_l2, head_dim)

    out = hadamard_feature_map(x, w1, b1, w2, b2)
    out = jax.block_until_ready(out)
    assert out.shape == x.shape

    # Tight check vs a reference using the same bf16 weight/input cast + f32 accum
    # (exactly what the kernel computes, independent of the lane-packing trick).
    xb2d = x.astype(jnp.bfloat16).reshape(-1, head_dim)
    y1b = jnp.dot(xb2d, w1.T.astype(jnp.bfloat16),
                  preferred_element_type=jnp.float32).reshape(x.shape) + b1
    y2b = jnp.dot(xb2d, w2.T.astype(jnp.bfloat16),
                  preferred_element_type=jnp.float32).reshape(x.shape) + b2
    ref_bf16 = y1b * y2b
    assert jnp.allclose(out, ref_bf16, atol=2e-3, rtol=2e-3), "mismatch vs bf16-matched reference"

    # Loose check vs the exact f32 PyTorch-module semantics (bf16 MXU rounding only).
    ref_f32 = (x @ w1.T + b1) * (x @ w2.T + b2)
    assert jnp.allclose(out, ref_f32, atol=1e-1, rtol=1e-1), "mismatch vs f32 reference"

    print("KERNEL_OK")
</pallas_src>

<mosaic_0001>
module attributes {stable_mosaic.version = 11 : i64} {
  func.func @_hadamard_kernel(%arg0: i32, %arg1: memref<8x128xf32, #tpu.memory_space<vmem>>, %arg2: memref<128x256xbf16, #tpu.memory_space<vmem>>, %arg3: memref<1x256xf32, #tpu.memory_space<vmem>>, %arg4: memref<8x128xf32, #tpu.memory_space<vmem>>) attributes {dimension_semantics = [#tpu.dimension_semantics<parallel>], iteration_bounds = array<i64: 1>, scalar_prefetch = 0 : i64, scratch_operands = 0 : i64, tpu.core_type = #tpu.core_type<tc>, window_params = [{transform_indices = @transform_0, window_bounds = array<i64: 8, 128>}, {pipeline_mode = #tpu.pipeline_mode<synchronous>, transform_indices = @transform_1, window_bounds = array<i64: 128, 256>}, {pipeline_mode = #tpu.pipeline_mode<synchronous>, transform_indices = @transform_2, window_bounds = array<i64: 1, 256>}, {transform_indices = @transform_3, window_bounds = array<i64: 8, 128>}]} {
    %c0 = arith.constant 0 : index
    %c0_0 = arith.constant 0 : index
    %0 = vector.load %arg1[%c0, %c0_0] : memref<8x128xf32, #tpu.memory_space<vmem>>, vector<8x128xf32>
    %1 = arith.truncf %0 : vector<8x128xf32> to vector<8x128xbf16>
    %c0_1 = arith.constant 0 : index
    %c0_2 = arith.constant 0 : index
    %2 = vector.load %arg2[%c0_1, %c0_2] : memref<128x256xbf16, #tpu.memory_space<vmem>>, vector<128x256xbf16>
    %cst = arith.constant dense<0.000000e+00> : vector<8x256xf32>
    %3 = tpu.matmul %1, %2, %cst {dimension_numbers = #tpu.dot_dimension_numbers<[1], [0], [0], [1], [0, 0, 1, 1], [], []>} : vector<8x128xbf16>, vector<128x256xbf16>, vector<8x256xf32> -> vector<8x256xf32>
    %c0_3 = arith.constant 0 : index
    %c0_4 = arith.constant 0 : index
    %4 = vector.load %arg3[%c0_3, %c0_4] : memref<1x256xf32, #tpu.memory_space<vmem>>, vector<1x256xf32>
    %5 = vector.broadcast %4 : vector<1x256xf32> to vector<8x256xf32>
    %6 = arith.addf %3, %5 : vector<8x256xf32>
    %7 = vector.extract_strided_slice %6 {offsets = [0, 0], sizes = [8, 128], strides = [1, 1]} : vector<8x256xf32> to vector<8x128xf32>
    %8 = vector.extract_strided_slice %6 {offsets = [0, 128], sizes = [8, 128], strides = [1, 1]} : vector<8x256xf32> to vector<8x128xf32>
    %9 = arith.mulf %7, %8 : vector<8x128xf32>
    %c0_5 = arith.constant 0 : index
    %c0_6 = arith.constant 0 : index
    %10 = vector.load %arg4[%c0_5, %c0_6] : memref<8x128xf32, #tpu.memory_space<vmem>>, vector<8x128xf32>
    tpu.vector_store %arg4[%c0_5, %c0_6], %9 {strides = array<i32>} : memref<8x128xf32, #tpu.memory_space<vmem>>, vector<8x128xf32>,
    return
  }
  func.func @transform_0(%arg0: i32) -> (i32, i32) {
    %c0_i32 = arith.constant 0 : i32
    %c0_i32_0 = arith.constant 0 : i32
    return %arg0, %c0_i32 : i32, i32
  }
  func.func @transform_1(%arg0: i32) -> (i32, i32) {
    %c0_i32 = arith.constant 0 : i32
    %c0_i32_0 = arith.constant 0 : i32
    %c0_i32_1 = arith.constant 0 : i32
    return %c0_i32, %c0_i32_0 : i32, i32
  }
  func.func @transform_2(%arg0: i32) -> (i32, i32) {
    %c0_i32 = arith.constant 0 : i32
    %c0_i32_0 = arith.constant 0 : i32
    %c0_i32_1 = arith.constant 0 : i32
    return %c0_i32, %c0_i32_0 : i32, i32
  }
  func.func @transform_3(%arg0: i32) -> (i32, i32) {
    %c0_i32 = arith.constant 0 : i32
    %c0_i32_0 = arith.constant 0 : i32
    return %arg0, %c0_i32 : i32, i32
  }
}

</mosaic_0001>

<bundles_post_ra>
// kernel: tpu_custom_call.1
= control target key start
LH: loop header
LB: loop body
LE: loop exit
PB: predicated region body
PF: predicated region fallthrough
CT: control target
= control target key end

     0   :  { %8 = vsyncpa [#allocation3], 0  ;;  %s434_s0 = inlined_call_operand.hbm [shape: f32[8,128], index: 0, kind: input, shape index: {}]   ;;  %s435_s1 = inlined_call_operand.hbm [shape: bf16[128,256], index: 1, kind: input, shape index: {}]   ;;  %s436_s2 = inlined_call_operand.hbm [shape: f32[1,256], index: 2, kind: input, shape index: {}]   ;;  %s437_s3 = inlined_call_operand.hbm [shape: f32[8,128], index: 3, kind: output, shape index: {}]  }
   0x1   :  { %9 = vsyncpa [#allocation6], 0  ;;  %s26_s14 = sshll.u32 %s435_s1, 4  ;;  %s27_s14 = int_to_ptr.hbm [resolvable:$true] %s26_s14 }
   0x2   :  { %10 = vsyncpa [#allocation4], 0  ;;  %s396_s15 = smov [#allocation5]   ;;  %s16_s19 = sshll.u32 %s434_s0, 4  ;;  %s17_s19 = int_to_ptr.hbm [resolvable:$true] %s16_s19 }
   0x3   :  { %s28_s16 = sshll.u32 %s396_s15, 4  ;;  %s397_s20 = smov 128   ;;  %s29_s16 = int_to_ptr.vmem [resolvable:$true] %s28_s16 }
   0x4   :  { %s398_s21 = smov 8   ;;  %s399_s22 = smov [#allocation2]  }
   0x5   :  { %34 = dma.hbm_to_vmem [thread:$0]  %s27_s14, 2048, %s29_s16, [#allocation6], %s397_s20, %s397_s20, %s398_s21  }
   0x6   :  { %s18_s23 = sshll.u32 %s399_s22, 4  ;;  %s40_s26 = sshll.u32 %s436_s2, 4  ;;  %s19_s23 = int_to_ptr.vmem [resolvable:$true] %s18_s23  ;;  %s41_s26 = int_to_ptr.hbm [resolvable:$true] %s40_s26 }
   0x7   :  { %21 = dma.hbm_to_vmem [thread:$0]  %s17_s19, 128, %s19_s23, [#allocation3]  }
   0x8   :  { %s400_s1 = smov [#allocation7]  }
   0x9   :  { %s42_s27 = sshll.u32 %s400_s1, 4  ;;  %s43_s27 = int_to_ptr.vmem [resolvable:$true] %s42_s27 }
   0xa   :  { %45 = dma.hbm_to_vmem [thread:$0]  %s41_s26, 32, %s43_s27, [#allocation6]  }
   0xb   :  { %390 = dma.done.wait [#allocation3], 128  }
   0xc   :  { %391 = vsyncadd [#allocation3], 4294967168 }
   0xd   :  { %392 = dma.done.wait [#allocation6], 2080  }
   0xe   :  { %393 = vsyncadd [#allocation6], 4294965216  ;;  %v266_v0 = vld [vmem:[#allocation5 + $0x70] sm:$0xf]  ;;  %v287_v1 = vld [vmem:[#allocation5 + $0x74] sm:$0xf0] }
   0xf   :  { %v286_v2 = vld [vmem:[#allocation5 + $0x74] sm:$0xf]  ;;  %v267_v3 = vor.u32 %v287_v1, %v266_v0  ;;  %v268_v4 = vld [vmem:[#allocation5 + $0x78] sm:$0xf0]  ;;  %v258_v5 = vld [vmem:[#allocation5 + $0x60] sm:$0xf] }
  0x10   :  { %v285_v6 = vld [vmem:[#allocation5 + $0x64] sm:$0xf0]  ;;  %v271_v7 = vor.u32 %v286_v2, %v268_v4  ;;  %v284_v8 = vld [vmem:[#allocation5 + $0x64] sm:$0xf]  ;;  %v260_v9 = vld [vmem:[#allocation5 + $0x68] sm:$0xf0] }
  0x11   :  { %162 = vmatpush.bf16.msra.mxu0 %v267_v3  ;;  %v259_v10 = vor.u32 %v285_v6, %v258_v5  ;;  %v263_v11 = vor.u32 %v284_v8, %v260_v9  ;;  %v250_v12 = vld [vmem:[#allocation5 + $0x50] sm:$0xf]  ;;  %v283_v13 = vld [vmem:[#allocation5 + $0x54] sm:$0xf0]  ;;  %v282_v14 = vld [vmem:[#allocation5 + $0x54] sm:$0xf] }
  0x12   :  { %175 = vmatpush.bf16.msra.mxu1 %v271_v7  ;;  %v252_v15 = vld [vmem:[#allocation5 + $0x58] sm:$0xf0]  ;;  %v251_v16 = vor.u32 %v283_v13, %v250_v12  ;;  %v242_v18 = vld [vmem:[#allocation5 + $0x40] sm:$0xf]  ;;  %v281_v19 = vld [vmem:[#allocation5 + $0x44] sm:$0xf0] }
  0x13   :  { %v255_v17 = vor.u32 %v282_v14, %v252_v15  ;;  %v280_v20 = vld [vmem:[#allocation5 + $0x44] sm:$0xf]  ;;  %v244_v21 = vld [vmem:[#allocation5 + $0x48] sm:$0xf0]  ;;  %v243_v22 = vor.u32 %v281_v19, %v242_v18  ;;  %v234_v24 = vld [vmem:[#allocation5 + $0x30] sm:$0xf] }
  0x14   :  { %v247_v23 = vor.u32 %v280_v20, %v244_v21  ;;  %v279_v25 = vld [vmem:[#allocation5 + $0x34] sm:$0xf0]  ;;  %v278_v26 = vld [vmem:[#allocation5 + $0x34] sm:$0xf]  ;;  %v236_v27 = vld [vmem:[#allocation5 + $0x38] sm:$0xf0] }
  0x15   :  { %163 = vmatpush.bf16.msra.mxu0 %v259_v10  ;;  %v235_v28 = vor.u32 %v279_v25, %v234_v24  ;;  %v239_v29 = vor.u32 %v278_v26, %v236_v27  ;;  %v226_v30 = vld [vmem:[#allocation5 + $0x20] sm:$0xf]  ;;  %v277_v31 = vld [vmem:[#allocation5 + $0x24] sm:$0xf0]  ;;  %v276_v32 = vld [vmem:[#allocation5 + $0x24] sm:$0xf] }
  0x16   :  { %176 = vmatpush.bf16.msra.mxu1 %v263_v11  ;;  %v228_v33 = vld [vmem:[#allocation5 + $0x28] sm:$0xf0]  ;;  %v227_v34 = vor.u32 %v277_v31, %v226_v30  ;;  %v218_v36 = vld [vmem:[#allocation5 + $0x10] sm:$0xf]  ;;  %v275_v37 = vld [vmem:[#allocation5 + $0x14] sm:$0xf0] }
  0x17   :  { %v231_v35 = vor.u32 %v276_v32, %v228_v33  ;;  %v274_v38 = vld [vmem:[#allocation5 + $0x14] sm:$0xf]  ;;  %v220_v39 = vld [vmem:[#allocation5 + $0x18] sm:$0xf0]  ;;  %v219_v40 = vor.u32 %v275_v37, %v218_v36  ;;  %v210_v42 = vld [vmem:[#allocation5] sm:$0xf] }
  0x18   :  { %v223_v41 = vor.u32 %v274_v38, %v220_v39  ;;  %v273_v43 = vld [vmem:[#allocation5 + $0x4] sm:$0xf0]  ;;  %v272_v44 = vld [vmem:[#allocation5 + $0x4] sm:$0xf]  ;;  %v212_v45 = vld [vmem:[#allocation5 + $0x8] sm:$0xf0] }
  0x19   :  { %164 = vmatpush.bf16.msra.mxu0 %v251_v16  ;;  %v211_v46 = vor.u32 %v273_v43, %v210_v42  ;;  %v58_v47 = vld [vmem:[#allocation2] sm:$0xff]  ;;  %v215_v48 = vor.u32 %v272_v44, %v212_v45  ;;  %v76_v50 = vld [vmem:[#allocation7] sm:$0x3]  ;;  %s401_s0 = smov [#allocation8]   ;;  %s197_s30 = sshll.u32 %s437_s3, 4  ;;  %s198_s30 = int_to_ptr.hbm [resolvable:$true] %s197_s30 }
  0x1a   :  { %177 = vmatpush.bf16.msra.mxu1 %v255_v17  ;;  %v59_v49 = vpack.c.bf16 %v58_v47, %v58_v47  ;;  %v78_v51 = vperm.slane %v76_v50, 0  ;;  %v79_v52 = vperm.slane %v76_v50, 1  ;;  %s195_s2 = sshll.u32 %s401_s0, 4  ;;  %s196_s2 = int_to_ptr.vmem [resolvable:$true] %s195_s2 }
  0x1d   :  { %165 = vmatpush.bf16.msra.mxu0 %v243_v22 }
  0x1e   :  { %178 = vmatpush.bf16.msra.mxu1 %v247_v23 }
  0x21   :  { %166 = vmatpush.bf16.msra.mxu0 %v235_v28 }
  0x22   :  { %179 = vmatpush.bf16.msra.mxu1 %v239_v29 }
  0x25   :  { %167 = vmatpush.bf16.msra.mxu0 %v227_v34 }
  0x26   :  { %180 = vmatpush.bf16.msra.mxu1 %v231_v35 }
  0x29   :  { %168 = vmatpush.bf16.msra.mxu0 %v219_v40 }
  0x2a   :  { %181 = vmatpush.bf16.msra.mxu1 %v223_v41 }
  0x2d   :  { %169 = vmatpush.bf16.msra.mxu0 %v211_v46 }
  0x2e   :  { %182 = vmatpush.bf16.msra.mxu1 %v215_v48 }
  0x30   :  { %170 = vmatmul.bf16.vlgmr.msra.gmra.mxu0 %v59_v49 }
  0x31   :  { %183 = vmatmul.bf16.vlgmr.msra.gmra.mxu1 %v59_v49 }
  0xad   :  { %v171_v53 = vpop.f32.mrf.mxu0 }
  0xae   :  { %v172_v54 = vadd.f32 %v171_v53, %v78_v51  ;;  %v184_v55 = vpop.f32.mrf.mxu1 }
  0xaf   :  { %v185_v56 = vadd.f32 %v184_v55, %v79_v52 }
  0xb1   :  { %v188_v57 = vmul.f32 %v185_v56, %v172_v54 }
  0xb3   :  { %189 = vst [vmem:[#allocation8] sm:$0xff] %v188_v57 }
  0xb4   :  { %200 = dma.vmem_to_hbm [thread:$0]  %s196_s2, 128, %s198_s30, [#allocation4]  }
  0xb5   :  { %v173_v58 = vpop.f32.mrf.mxu0 }
  0xb6   :  { %v186_v59 = vpop.f32.mrf.mxu1 }
  0xb7   :  { %394 = dma.done.wait [#allocation4], 128  }
  0xb8   :  { %395 = vsyncadd [#allocation4], 4294967168 }
  0xb9   :  { %205 = vsyncpa [#allocation3], 1 }
  0xba   :  { %206 = vsyncpa [#allocation6], 1 }
  0xbb   :  { %207 = vsyncpa [#allocation4], 1 }

</bundles_post_ra>
